<compile_context>
chip_gen: v7x
topology: tpu7x:2x2x1
jax: 0.10.0
libtpu: 0.0.40
codegen_flags: <defaults>
</compile_context>

<pallas_src>
import functools

import jax
import jax.numpy as jnp
from jax.experimental import pallas as pl
from jax.experimental.pallas import tpu as pltpu


def _layernorm_kernel(x_ref, g_ref, b_ref, o_ref, *, eps):
    """One grid step normalizes one (tm, Hs) row tile."""
    x = x_ref[...].astype(jnp.float32)
    u = jnp.mean(x, axis=-1, keepdims=True)
    d = x - u
    s = jnp.mean(d * d, axis=-1, keepdims=True)
    inv = jax.lax.rsqrt(s + eps)                      # EUP rsqrt, keeps VALU free
    y = g_ref[...] * (d * inv) + b_ref[...]
    o_ref[...] = y.astype(o_ref.dtype)


@functools.partial(jax.jit,
                   static_argnames=("sample_hidden_dim", "eps", "row_tile"))
def super_bert_layer_norm(x, weight, bias, sample_hidden_dim,
                          eps=1e-12, row_tile=256):
    """x: (..., sample_hidden_dim). weight/bias: (super_hidden,) full params."""
    Hs = sample_hidden_dim
    assert x.shape[-1] == Hs, "input last dim must equal sample_hidden_dim"

    # --- sample_* slicing (parameter glue, plain JAX) ---
    gamma = weight[:Hs].reshape(1, Hs).astype(jnp.float32)
    beta = bias[:Hs].reshape(1, Hs).astype(jnp.float32)

    lead_shape = x.shape[:-1]
    M = 1
    for d in lead_shape:
        M *= d
    x2d = x.reshape(M, Hs)

    # Row tile: multiple of 8 (sublane), capped at row_tile; pad rows if needed.
    tm = min(row_tile, pl.cdiv(M, 8) * 8)
    Mp = pl.cdiv(M, tm) * tm
    if Mp != M:
        x2d = jnp.pad(x2d, ((0, Mp - M), (0, 0)))

    out2d = pl.pallas_call(
        functools.partial(_layernorm_kernel, eps=eps),
        out_shape=jax.ShapeDtypeStruct((Mp, Hs), x.dtype),
        grid=(Mp // tm,),
        in_specs=[
            pl.BlockSpec((tm, Hs), lambda i: (i, 0)),   # x row tile
            pl.BlockSpec((1, Hs), lambda i: (0, 0)),    # gamma (resident)
            pl.BlockSpec((1, Hs), lambda i: (0, 0)),    # beta  (resident)
        ],
        out_specs=pl.BlockSpec((tm, Hs), lambda i: (i, 0)),
        compiler_params=pltpu.CompilerParams(
            dimension_semantics=("parallel",),          # independent row tiles
            vmem_limit_bytes=64 * 1024 * 1024,
        ),
    )(x2d, gamma, beta)

    if Mp != M:
        out2d = out2d[:M]
    return out2d.reshape(*lead_shape, Hs)


def _reference(x, weight, bias, Hs, eps=1e-12):
    """Pure-JAX reference mirroring the PyTorch module."""
    g = weight[:Hs]
    b = bias[:Hs]
    u = jnp.mean(x, axis=-1, keepdims=True)
    s = jnp.mean((x - u) ** 2, axis=-1, keepdims=True)
    xn = (x - u) / jnp.sqrt(s + eps)
    return g * xn + b


if __name__ == "__main__":
    key = jax.random.PRNGKey(0)
    B, S = 2, 8
    super_hidden = 64          # config.hidden_size (super-net width)
    sample_hidden_dim = 32     # sampled sub-net width

    kx, kg, kb = jax.random.split(key, 3)
    # Module init is weight=ones, bias=zeros; use random values here to make the
    # affine part of the check non-trivial (forward semantics are identical).
    weight = 1.0 + 0.1 * jax.random.normal(kg, (super_hidden,), jnp.float32)
    bias = 0.1 * jax.random.normal(kb, (super_hidden,), jnp.float32)
    x = jax.random.normal(kx, (B, S, sample_hidden_dim), jnp.float32)

    y = super_bert_layer_norm(x, weight, bias, sample_hidden_dim)
    y = jax.block_until_ready(y)

    ref = _reference(x, weight, bias, sample_hidden_dim)
    assert y.shape == (B, S, sample_hidden_dim)
    assert jnp.allclose(y, ref, atol=1e-5, rtol=1e-5), "mismatch vs reference"
    print("KERNEL_OK")
</pallas_src>

<mosaic_0001>
module attributes {stable_mosaic.version = 11 : i64} {
  func.func @_layernorm_kernel(%arg0: i32, %arg1: memref<16x32xf32, #tpu.memory_space<vmem>>, %arg2: memref<1x32xf32, #tpu.memory_space<vmem>>, %arg3: memref<1x32xf32, #tpu.memory_space<vmem>>, %arg4: memref<16x32xf32, #tpu.memory_space<vmem>>) attributes {dimension_semantics = [#tpu.dimension_semantics<parallel>], iteration_bounds = array<i64: 1>, scalar_prefetch = 0 : i64, scratch_operands = 0 : i64, tpu.core_type = #tpu.core_type<tc>, window_params = [{transform_indices = @transform_0, window_bounds = array<i64: 16, 32>}, {pipeline_mode = #tpu.pipeline_mode<synchronous>, transform_indices = @transform_1, window_bounds = array<i64: 1, 32>}, {pipeline_mode = #tpu.pipeline_mode<synchronous>, transform_indices = @transform_2, window_bounds = array<i64: 1, 32>}, {transform_indices = @transform_3, window_bounds = array<i64: 16, 32>}]} {
    %c0 = arith.constant 0 : index
    %c0_0 = arith.constant 0 : index
    %0 = vector.load %arg1[%c0, %c0_0] : memref<16x32xf32, #tpu.memory_space<vmem>>, vector<16x32xf32>
    %cst = arith.constant dense<0.000000e+00> : vector<16xf32>
    %1 = vector.multi_reduction <add>, %0, %cst [1] : vector<16x32xf32> to vector<16xf32>
    %2 = vector.shape_cast %1 : vector<16xf32> to vector<16x1xf32>
    %cst_1 = arith.constant 3.200000e+01 : f32
    %3 = vector.broadcast %cst_1 : f32 to vector<16x1xf32>
    %4 = arith.divf %2, %3 : vector<16x1xf32>
    %5 = vector.broadcast %4 : vector<16x1xf32> to vector<16x32xf32>
    %6 = arith.subf %0, %5 : vector<16x32xf32>
    %7 = arith.mulf %6, %6 : vector<16x32xf32>
    %cst_2 = arith.constant dense<0.000000e+00> : vector<16xf32>
    %8 = vector.multi_reduction <add>, %7, %cst_2 [1] : vector<16x32xf32> to vector<16xf32>
    %9 = vector.shape_cast %8 : vector<16xf32> to vector<16x1xf32>
    %cst_3 = arith.constant 3.200000e+01 : f32
    %10 = vector.broadcast %cst_3 : f32 to vector<16x1xf32>
    %11 = arith.divf %9, %10 : vector<16x1xf32>
    %cst_4 = arith.constant 9.99999996E-13 : f32
    %12 = vector.broadcast %cst_4 : f32 to vector<16x1xf32>
    %13 = arith.addf %11, %12 : vector<16x1xf32>
    %14 = math.rsqrt %13 : vector<16x1xf32>
    %c0_5 = arith.constant 0 : index
    %c0_6 = arith.constant 0 : index
    %15 = vector.load %arg2[%c0_5, %c0_6] : memref<1x32xf32, #tpu.memory_space<vmem>>, vector<1x32xf32>
    %16 = vector.broadcast %14 : vector<16x1xf32> to vector<16x32xf32>
    %17 = arith.mulf %6, %16 : vector<16x32xf32>
    %18 = vector.broadcast %15 : vector<1x32xf32> to vector<16x32xf32>
    %19 = arith.mulf %18, %17 : vector<16x32xf32>
    %c0_7 = arith.constant 0 : index
    %c0_8 = arith.constant 0 : index
    %20 = vector.load %arg3[%c0_7, %c0_8] : memref<1x32xf32, #tpu.memory_space<vmem>>, vector<1x32xf32>
    %21 = vector.broadcast %20 : vector<1x32xf32> to vector<16x32xf32>
    %22 = arith.addf %19, %21 : vector<16x32xf32>
    %c0_9 = arith.constant 0 : index
    %c0_10 = arith.constant 0 : index
    %23 = vector.load %arg4[%c0_9, %c0_10] : memref<16x32xf32, #tpu.memory_space<vmem>>, vector<16x32xf32>
    tpu.vector_store %arg4[%c0_9, %c0_10], %22 {strides = array<i32>} : memref<16x32xf32, #tpu.memory_space<vmem>>, vector<16x32xf32>,
    return
  }
  func.func @transform_0(%arg0: i32) -> (i32, i32) {
    %c0_i32 = arith.constant 0 : i32
    %c0_i32_0 = arith.constant 0 : i32
    return %arg0, %c0_i32 : i32, i32
  }
  func.func @transform_1(%arg0: i32) -> (i32, i32) {
    %c0_i32 = arith.constant 0 : i32
    %c0_i32_0 = arith.constant 0 : i32
    %c0_i32_1 = arith.constant 0 : i32
    return %c0_i32, %c0_i32_0 : i32, i32
  }
  func.func @transform_2(%arg0: i32) -> (i32, i32) {
    %c0_i32 = arith.constant 0 : i32
    %c0_i32_0 = arith.constant 0 : i32
    %c0_i32_1 = arith.constant 0 : i32
    return %c0_i32, %c0_i32_0 : i32, i32
  }
  func.func @transform_3(%arg0: i32) -> (i32, i32) {
    %c0_i32 = arith.constant 0 : i32
    %c0_i32_0 = arith.constant 0 : i32
    return %arg0, %c0_i32 : i32, i32
  }
}

</mosaic_0001>

<bundles_post_ra>
// kernel: super_bert_layer_norm.1
= control target key start
LH: loop header
LB: loop body
LE: loop exit
PB: predicated region body
PF: predicated region fallthrough
CT: control target
= control target key end

     0   :  { %8 = vsyncpa [#allocation3], 0  ;;  %s319_s0 = inlined_call_operand.hbm [shape: f32[16,32], index: 0, kind: input, shape index: {}]   ;;  %s320_s1 = inlined_call_operand.hbm [shape: f32[1,32], index: 1, kind: input, shape index: {}]   ;;  %s321_s2 = inlined_call_operand.hbm [shape: f32[1,32], index: 2, kind: input, shape index: {}]   ;;  %s322_s3 = inlined_call_operand.hbm [shape: f32[16,32], index: 3, kind: output, shape index: {}]  }
   0x1   :  { %9 = vsyncpa [#allocation6], 0 }
   0x2   :  { %10 = vsyncpa [#allocation4], 0  ;;  %s226_s12 = smov [#allocation5]   ;;  %s227_s14 = smov [#allocation2]  }
   0x3   :  { %s29_s13 = sshll.u32 %s226_s12, 4  ;;  %s16_s15 = sshll.u32 %s227_s14, 4  ;;  %s30_s13 = int_to_ptr.vmem [resolvable:$true] %s29_s13  ;;  %s252_s15 = int_to_ptr.vmem [resolvable:$true] %s16_s15 }
   0x4   :  { %s132_s18 = scalar_lea.hbm %s320_s1, 16 }
   0x5   :  { %p133_p0 = scmp.ne.s32.totalorder %s320_s1, %s132_s18  ;;  %p136_p1 = scmp.lt.u32.totalorder %s132_s18, %s320_s1 }
   0x7   :  { %p138_p2 = pnand %p136_p1, %p133_p0 }
   0x9   :  { %141 = shalt.err (!%p138_p2)
}
   0xa   :  { %s142_s23 = scalar_lea.vmem %s30_s13, 16  ;;  %s146_s24 = scalar_lea.vmem %s30_s13, 32 }
   0xb   :  { %p143_p3 = scmp.ne.s32.totalorder %s30_s13, %s142_s23  ;;  %p147_p4 = scmp.lt.s32.totalorder %s30_s13, %s30_s13 }
   0xc   :  { %p148_p5 = scmp.lt.s32.totalorder %s146_s24, %s142_s23 }
   0xe   :  { %p149_p6 = por %p148_p5, %p147_p4 }
  0x10   :  { %p150_p7 = pnand %p149_p6, %p143_p3 }
  0x12   :  { %153 = shalt.err (!%p150_p7)
}
  0x13   :  { %32 = dma.hbm_to_vmem [thread:$0]  %s320_s1, 16, %s30_s13, [#allocation6]  }
  0x14   :  { %s154_s29 = scalar_lea.hbm %s319_s0, 256 }
  0x15   :  { %p155_p8 = scmp.ne.s32.totalorder %s319_s0, %s154_s29  ;;  %p158_p9 = scmp.lt.u32.totalorder %s154_s29, %s319_s0 }
  0x17   :  { %p160_p10 = pnand %p158_p9, %p155_p8 }
  0x19   :  { %163 = shalt.err (!%p160_p10)
}
  0x1a   :  { %s164_s7 = scalar_lea.vmem %s252_s15, 256  ;;  %p169_p12 = scmp.lt.s32.totalorder %s252_s15, %s252_s15 }
  0x1b   :  { %p165_p11 = scmp.ne.s32.totalorder %s252_s15, %s164_s7  ;;  %p170_p13 = scmp.lt.s32.totalorder %s164_s7, %s164_s7 }
  0x1d   :  { %p171_p0 = por %p170_p13, %p169_p12 }
  0x1f   :  { %p172_p1 = pnand %p171_p0, %p165_p11 }
  0x21   :  { %175 = shalt.err (!%p172_p1)
}
  0x22   :  { %s228_s1 = smov 128   ;;  %s229_s8 = smov 8  }
  0x23   :  { %22 = dma.hbm_to_vmem [thread:$0]  %s319_s0, 256, %s252_s15, [#allocation3], %s228_s1, %s228_s1, %s229_s8  }
  0x24   :  { %s230_s11 = smov [#allocation7]   ;;  %s176_s16 = scalar_lea.hbm %s321_s2, 16 }
  0x25   :  { %s39_s12 = sshll.u32 %s230_s11, 4  ;;  %p177_p2 = scmp.ne.s32.totalorder %s321_s2, %s176_s16  ;;  %s40_s12 = int_to_ptr.vmem [resolvable:$true] %s39_s12 }
  0x26   :  { %p180_p3 = scmp.lt.u32.totalorder %s176_s16, %s321_s2 }
  0x28   :  { %p182_p4 = pnand %p180_p3, %p177_p2 }
  0x2a   :  { %185 = shalt.err (!%p182_p4)
}
  0x2b   :  { %s186_s21 = scalar_lea.vmem %s40_s12, 16  ;;  %s190_s0 = scalar_lea.vmem %s40_s12, 32 }
  0x2c   :  { %p187_p5 = scmp.ne.s32.totalorder %s40_s12, %s186_s21  ;;  %p191_p6 = scmp.lt.s32.totalorder %s40_s12, %s40_s12 }
  0x2d   :  { %p192_p7 = scmp.lt.s32.totalorder %s190_s0, %s186_s21 }
  0x2f   :  { %p193_p8 = por %p192_p7, %p191_p6 }
  0x31   :  { %p194_p9 = pnand %p193_p8, %p187_p5 }
  0x33   :  { %197 = shalt.err (!%p194_p9)
}
  0x34   :  { %42 = dma.hbm_to_vmem [thread:$0]  %s321_s2, 16, %s40_s12, [#allocation6]  }
  0x35   :  { %220 = dma.done.wait [#allocation3], 256  }
  0x36   :  { %221 = vsyncadd [#allocation3], 4294967040 }
  0x37   :  { %222 = dma.done.wait [#allocation6], 32  }
  0x38   :  { %223 = vsyncadd [#allocation6], 4294967264  ;;  %vm54_vm0 = vcmask 261120   ;;  %v52_v0 = vld [vmem:[#allocation2] sm:$0xff]  ;;  %v53_v1 = vld [vmem:[#allocation2 + $0x8] sm:$0xff]  ;;  %s231_s2 = smov [#allocation8]  }
  0x39   :  { %v55_v2 = vsel %vm54_vm0, %v52_v0, 0.0  ;;  %v58_v3 = vsel %vm54_vm0, %v53_v1, 0.0  ;;  %v120_v21 = vld [vmem:[#allocation5] ss:$0 sm:$0xff]  ;;  %v121_v23 = vld [vmem:[#allocation7] ss:$0 sm:$0xff] }
  0x3a   :  { %56 = vadd.xlane.f32.xlu0 %v55_v2  ;;  %s107_s23 = sshll.u32 %s231_s2, 4  ;;  %s108_s23 = int_to_ptr.vmem [resolvable:$true] %s107_s23 }
  0x3b   :  { %s198_s24 = scalar_lea.vmem %s108_s23, 256  ;;  %p203_p11 = scmp.lt.s32.totalorder %s108_s23, %s108_s23 }
  0x3c   :  { %p199_p10 = scmp.ne.s32.totalorder %s108_s23, %s198_s24  ;;  %p204_p12 = scmp.lt.s32.totalorder %s198_s24, %s198_s24 }
  0x3e   :  { %59 = vadd.xlane.f32.xlu0 %v58_v3  ;;  %p205_p13 = por %p204_p12, %p203_p11 }
  0x40   :  { %p206_p0 = pnand %p205_p13, %p199_p10 }
  0xc7   :  { %v57_v4 = vpop.xlane.xlu0 %56 }
  0xc8   :  { %v62_v5 = vmul.f32 0.03125, %v57_v4 }
  0xca   :  { %v64_v6 = vsub.f32 %v52_v0, %v62_v5 }
  0xcb   :  { %v60_v7 = vpop.xlane.xlu0 %59 }
  0xcc   :  { %v63_v8 = vmul.f32 0.03125, %v60_v7  ;;  %v66_v9 = vmul.f32 %v64_v6, %v64_v6 }
  0xce   :  { %v65_v10 = vsub.f32 %v53_v1, %v63_v8  ;;  %v68_v11 = vsel %vm54_vm0, %v66_v9, 0.0 }
  0xcf   :  { %69 = vadd.xlane.f32.xlu1 %v68_v11 }
  0xd0   :  { %v67_v12 = vmul.f32 %v65_v10, %v65_v10 }
  0xd2   :  { %v71_v13 = vsel %vm54_vm0, %v67_v12, 0.0 }
  0xd3   :  { %72 = vadd.xlane.f32.xlu1 %v71_v13 }
 0x15c   :  { %v70_v14 = vpop.xlane.xlu1 %69 }
 0x15d   :  { %v74_v15 = vmul.f32 0.03125, %v70_v14 }
 0x15f   :  { %v76_v16 = vadd.f32 1e-12, %v74_v15 }
 0x160   :  { %v73_v17 = vpop.xlane.xlu1 %72 }
 0x161   :  { %128 = vrsqrt.f32 %v76_v16  ;;  %v75_v18 = vmul.f32 0.03125, %v73_v17 }
 0x163   :  { %v77_v19 = vadd.f32 1e-12, %v75_v18 }
 0x165   :  { %130 = vrsqrt.f32 %v77_v19 }
 0x16b   :  { %v129_v20 = vpop.eup %128 }
 0x16c   :  { %v81_v22 = vmul.f32 %v129_v20, %v64_v6 }
 0x16e   :  { %v89_v24 = vmul.f32 %v120_v21, %v81_v22 }
 0x16f   :  { %v131_v25 = vpop.eup %130 }
 0x170   :  { %v82_v26 = vmul.f32 %v131_v25, %v65_v10  ;;  %v98_v27 = vadd.f32 %v121_v23, %v89_v24 }
 0x172   :  { %v90_v28 = vmul.f32 %v120_v21, %v82_v26  ;;  %100 = vst.msk [vmem:[#allocation8] sm:$0xff] %vm54_vm0, %v98_v27 }
 0x174   :  { %v99_v29 = vadd.f32 %v121_v23, %v90_v28 }
 0x176   :  { %101 = vst.msk [vmem:[#allocation8 + $0x8] sm:$0xff] %vm54_vm0, %v99_v29 }
 0x177   :  { %209 = shalt.err (!%p206_p0)
}
 0x178   :  { %s210_s27 = scalar_lea.hbm %s322_s3, 256 }
 0x179   :  { %p211_p1 = scmp.ne.s32.totalorder %s322_s3, %s210_s27  ;;  %p214_p2 = scmp.lt.u32.totalorder %s210_s27, %s322_s3 }
 0x17b   :  { %p216_p3 = pnand %p214_p2, %p211_p1 }
 0x17d   :  { %219 = shalt.err (!%p216_p3)
}
 0x17e   :  { %113 = dma.vmem_to_hbm [thread:$0]  %s108_s23, 256, %s322_s3, [#allocation4], %s228_s1, %s228_s1, %s229_s8  }
 0x17f   :  { %224 = dma.done.wait [#allocation4], 256  }
 0x180   :  { %225 = vsyncadd [#allocation4], 4294967040 }
 0x181   :  { %117 = vsyncpa [#allocation3], 1 }
 0x182   :  { %118 = vsyncpa [#allocation6], 1 }
 0x183   :  { %119 = vsyncpa [#allocation4], 1 }

</bundles_post_ra>
